<compile_context>
chip_gen: v7x
topology: tpu7x:2x2x1
jax: 0.10.0
libtpu: 0.0.40
codegen_flags: <defaults>
</compile_context>

<pallas_src>
import functools

import jax
import jax.numpy as jnp
from jax.experimental import pallas as pl
from jax.experimental.pallas import tpu as pltpu

_TM = 128        # batch tile (clamped to the padded batch when smaller)
_TK = 1024       # contraction tile over D = C*H*W (innermost grid axis)
                 # VMEM: 2x dbl-buffered (tm*tk + tk*Fp) bf16 ≈ 1 MiB at
                 # tm=128, tk=1024, Fp=128 — well under budget on v5e/v6e/v7x.
_LANE = 128      # lane-dense padding for feature_dim / n_classes
_SUBLANE = 16    # bf16 sublane multiple for the batch dim


def _round_up(x, m):
    return (x + m - 1) // m * m


def _pad_contract(d):
    # Pad D so that it is tiled exactly by tk = min(_TK, Dp).
    return _round_up(d, _TK) if d >= _TK else _round_up(d, _LANE)


def linmodel_kernel(x_ref, we_ref, be_ref, wl_ref, bl_ref, o_ref, acc_ref):
    """Fused encoder (x @ We + be) and classifier head (h @ Wl + bl).

    Grid = (batch tiles, K tiles over D). The (tm, Fp) f32 feature accumulator
    lives in VMEM across K; biases + head matmul run only on the last K step.
    """
    k = pl.program_id(1)

    @pl.when(k == 0)
    def _():
        acc_ref[...] = jnp.zeros_like(acc_ref)

    # Encoder partial product on the MXU (bf16 in, f32 accumulate).
    acc_ref[...] += jnp.dot(x_ref[...], we_ref[...],
                            preferred_element_type=jnp.float32)

    @pl.when(k == pl.num_programs(1) - 1)
    def _():
        # Bias add in f32 (v5e VPU has no bf16 path), then the tiny head matmul
        # (Fp x 128, lane-dense) rides in the MXU slot of the final iteration.
        h = acc_ref[...] + be_ref[...]
        y = jnp.dot(h.astype(wl_ref.dtype), wl_ref[...],
                    preferred_element_type=jnp.float32)
        o_ref[...] = (y + bl_ref[...]).astype(o_ref.dtype)


def prepare_params(w_enc, b_enc, w_lin, b_lin):
    """One-time parameter prep — run at load time, NOT per forward call.

    Transposes PyTorch (out, in) weights to (in, out), zero-pads D to the K
    tile, feature_dim / n_classes to lane-dense multiples of 128, and casts
    weights to bf16 (kernel accumulates in f32). Biases stay f32.
    """
    F_, D = w_enc.shape
    NC = w_lin.shape[0]
    Dp = _pad_contract(D)
    Fp = _round_up(F_, _LANE)
    NCp = _round_up(NC, _LANE)

    we_t = jnp.pad(jnp.asarray(w_enc, jnp.float32).T,
                   ((0, Dp - D), (0, Fp - F_))).astype(jnp.bfloat16)     # (Dp, Fp)
    be = jnp.pad(jnp.asarray(b_enc, jnp.float32).reshape(1, F_),
                 ((0, 0), (0, Fp - F_)))                                  # (1, Fp) f32
    wl_t = jnp.pad(jnp.asarray(w_lin, jnp.float32).T,
                   ((0, Fp - F_), (0, NCp - NC))).astype(jnp.bfloat16)    # (Fp, NCp)
    bl = jnp.pad(jnp.asarray(b_lin, jnp.float32).reshape(1, NC),
                 ((0, 0), (0, NCp - NC)))                                 # (1, NCp) f32
    return we_t, be, wl_t, bl


@functools.partial(jax.jit, static_argnames=("n_classes",))
def linmodel_forward(x, we_t, be, wl_t, bl, *, n_classes):
    """x: (B, C, H, W) f32. Params as produced by prepare_params."""
    B = x.shape[0]
    x2 = x.reshape(B, -1)
    D = x2.shape[1]
    Dp, Fp = we_t.shape
    NCp = wl_t.shape[1]

    # Batch: pad to a bf16 sublane multiple; tile with tm = min(_TM, Bp).
    if B <= _TM:
        Bp = _round_up(B, _SUBLANE)
        tm = Bp
    else:
        Bp = _round_up(B, _TM)
        tm = _TM
    tk = min(_TK, Dp)

    # Cast to bf16 BEFORE padding: halves the wrapper-side copy bandwidth.
    x2p = jnp.pad(x2.astype(jnp.bfloat16), ((0, Bp - B), (0, Dp - D)))

    grid = (Bp // tm, Dp // tk)
    flops = 2 * Bp * Dp * Fp + 2 * Bp * Fp * NCp
    bytes_accessed = (Bp * Dp * 2 + Dp * Fp * 2 + Fp * NCp * 2
                      + Fp * 4 + NCp * 4 + Bp * NCp * 4)

    out = pl.pallas_call(
        linmodel_kernel,
        out_shape=jax.ShapeDtypeStruct((Bp, NCp), jnp.float32),
        grid_spec=pltpu.PrefetchScalarGridSpec(
            num_scalar_prefetch=0,
            grid=grid,
            in_specs=[
                pl.BlockSpec((tm, tk), lambda i, k: (i, k)),     # x tile (bf16)
                pl.BlockSpec((tk, Fp), lambda i, k: (k, 0)),     # W_enc tile (bf16)
                pl.BlockSpec((1, Fp), lambda i, k: (0, 0)),      # b_enc (resident, f32)
                pl.BlockSpec((Fp, NCp), lambda i, k: (0, 0)),    # W_lin (resident, bf16)
                pl.BlockSpec((1, NCp), lambda i, k: (0, 0)),     # b_lin (resident, f32)
            ],
            out_specs=pl.BlockSpec((tm, NCp), lambda i, k: (i, 0)),  # lane-dense
            scratch_shapes=[pltpu.VMEM((tm, Fp), jnp.float32)],      # f32 accumulator
        ),
        compiler_params=pltpu.CompilerParams(
            dimension_semantics=("parallel", "arbitrary"),
            vmem_limit_bytes=64 * 1024 * 1024,
        ),
        cost_estimate=pl.CostEstimate(
            flops=flops, transcendentals=0, bytes_accessed=bytes_accessed),
    )(x2p, we_t, be, wl_t, bl)

    # Slice the zero-padded batch rows / class columns off.
    return out[:B, :n_classes]


if __name__ == "__main__":
    # Small shapes consistent with the forward: image batch -> encoder features
    # -> linear classifier.
    B, C, H, W = 2, 4, 16, 16
    feature_dim = 32
    n_classes = 10
    D = C * H * W

    key = jax.random.PRNGKey(0)
    kx, kwe, kbe, kwl, kbl = jax.random.split(key, 5)

    x = jax.random.normal(kx, (B, C, H, W), dtype=jnp.float32)
    # Deterministic parameter init (PyTorch nn.Linear layout: (out, in)).
    w_enc = jax.random.normal(kwe, (feature_dim, D), dtype=jnp.float32) * 0.02
    b_enc = jax.random.normal(kbe, (feature_dim,), dtype=jnp.float32) * 0.02
    w_lin = jax.random.normal(kwl, (n_classes, feature_dim), dtype=jnp.float32) * 0.02
    b_lin = jax.random.normal(kbl, (n_classes,), dtype=jnp.float32) * 0.02

    # One-time parameter prep (transpose + lane-dense zero-pad + bf16 cast),
    # outside the per-call hot path.
    we_t, be, wl_t, bl = prepare_params(w_enc, b_enc, w_lin, b_lin)

    out = linmodel_forward(x, we_t, be, wl_t, bl, n_classes=n_classes)
    out = jax.block_until_ready(out)

    # Pure-JAX reference with matching bf16 weight/activation quantization and
    # f32 accumulation.
    xq = x.reshape(B, -1).astype(jnp.bfloat16).astype(jnp.float32)
    weq = w_enc.astype(jnp.bfloat16).astype(jnp.float32)
    wlq = w_lin.astype(jnp.bfloat16).astype(jnp.float32)
    h_ref = xq @ weq.T + b_enc
    y_ref = h_ref.astype(jnp.bfloat16).astype(jnp.float32) @ wlq.T + b_lin

    assert out.shape == (B, n_classes)
    assert jnp.allclose(out, y_ref, atol=2e-2, rtol=2e-2), "mismatch vs reference"

    print("KERNEL_OK")
</pallas_src>

<mosaic_0001>
module attributes {stable_mosaic.version = 11 : i64} {
  func.func @linmodel_kernel(%arg0: i32, %arg1: i32, %arg2: memref<16x1024xbf16, #tpu.memory_space<vmem>>, %arg3: memref<1024x128xbf16, #tpu.memory_space<vmem>>, %arg4: memref<1x128xf32, #tpu.memory_space<vmem>>, %arg5: memref<128x128xbf16, #tpu.memory_space<vmem>>, %arg6: memref<1x128xf32, #tpu.memory_space<vmem>>, %arg7: memref<16x128xf32, #tpu.memory_space<vmem>>, %arg8: memref<16x128xf32, #tpu.memory_space<vmem>>) attributes {dimension_semantics = [#tpu.dimension_semantics<parallel>, #tpu.dimension_semantics<arbitrary>], iteration_bounds = array<i64: 1, 1>, scalar_prefetch = 0 : i64, scratch_operands = 1 : i64, tpu.core_type = #tpu.core_type<tc>, window_params = [{transform_indices = @transform_0, window_bounds = array<i64: 16, 1024>}, {transform_indices = @transform_1, window_bounds = array<i64: 1024, 128>}, {pipeline_mode = #tpu.pipeline_mode<synchronous>, transform_indices = @transform_2, window_bounds = array<i64: 1, 128>}, {pipeline_mode = #tpu.pipeline_mode<synchronous>, transform_indices = @transform_3, window_bounds = array<i64: 128, 128>}, {pipeline_mode = #tpu.pipeline_mode<synchronous>, transform_indices = @transform_4, window_bounds = array<i64: 1, 128>}, {transform_indices = @transform_5, window_bounds = array<i64: 16, 128>}]} {
    %c0_i32 = arith.constant 0 : i32
    %0 = arith.cmpi eq, %arg1, %c0_i32 : i32
    %1 = arith.extui %0 : i1 to i32
    %c0_i32_0 = arith.constant 0 : i32
    %2 = arith.cmpi ne, %1, %c0_i32_0 : i32
    scf.if %2 {
      %cst_10 = arith.constant 0.000000e+00 : f32
      %12 = vector.broadcast %cst_10 : f32 to vector<16x128xf32>
      %c0_11 = arith.constant 0 : index
      %c0_12 = arith.constant 0 : index
      %13 = vector.load %arg8[%c0_11, %c0_12] : memref<16x128xf32, #tpu.memory_space<vmem>>, vector<16x128xf32>
      tpu.vector_store %arg8[%c0_11, %c0_12], %12 {strides = array<i32>} : memref<16x128xf32, #tpu.memory_space<vmem>>, vector<16x128xf32>,
    } else {
    }
    %c0 = arith.constant 0 : index
    %c0_1 = arith.constant 0 : index
    %3 = vector.load %arg8[%c0, %c0_1] : memref<16x128xf32, #tpu.memory_space<vmem>>, vector<16x128xf32>
    %c0_2 = arith.constant 0 : index
    %c0_3 = arith.constant 0 : index
    %4 = vector.load %arg2[%c0_2, %c0_3] : memref<16x1024xbf16, #tpu.memory_space<vmem>>, vector<16x1024xbf16>
    %c0_4 = arith.constant 0 : index
    %c0_5 = arith.constant 0 : index
    %5 = vector.load %arg3[%c0_4, %c0_5] : memref<1024x128xbf16, #tpu.memory_space<vmem>>, vector<1024x128xbf16>
    %cst = arith.constant dense<0.000000e+00> : vector<16x128xf32>
    %6 = tpu.matmul %4, %5, %cst {dimension_numbers = #tpu.dot_dimension_numbers<[1], [0], [0], [1], [0, 0, 1, 1], [], []>} : vector<16x1024xbf16>, vector<1024x128xbf16>, vector<16x128xf32> -> vector<16x128xf32>
    %7 = arith.addf %3, %6 : vector<16x128xf32>
    %c0_6 = arith.constant 0 : index
    %c0_7 = arith.constant 0 : index
    %8 = vector.load %arg8[%c0_6, %c0_7] : memref<16x128xf32, #tpu.memory_space<vmem>>, vector<16x128xf32>
    tpu.vector_store %arg8[%c0_6, %c0_7], %7 {strides = array<i32>} : memref<16x128xf32, #tpu.memory_space<vmem>>, vector<16x128xf32>,
    %c0_i32_8 = arith.constant 0 : i32
    %9 = arith.cmpi eq, %arg1, %c0_i32_8 : i32
    %10 = arith.extui %9 : i1 to i32
    %c0_i32_9 = arith.constant 0 : i32
    %11 = arith.cmpi ne, %10, %c0_i32_9 : i32
    scf.if %11 {
      %c0_10 = arith.constant 0 : index
      %c0_11 = arith.constant 0 : index
      %12 = vector.load %arg8[%c0_10, %c0_11] : memref<16x128xf32, #tpu.memory_space<vmem>>, vector<16x128xf32>
      %c0_12 = arith.constant 0 : index
      %c0_13 = arith.constant 0 : index
      %13 = vector.load %arg4[%c0_12, %c0_13] : memref<1x128xf32, #tpu.memory_space<vmem>>, vector<1x128xf32>
      %14 = vector.broadcast %13 : vector<1x128xf32> to vector<16x128xf32>
      %15 = arith.addf %12, %14 : vector<16x128xf32>
      %16 = arith.truncf %15 : vector<16x128xf32> to vector<16x128xbf16>
      %c0_14 = arith.constant 0 : index
      %c0_15 = arith.constant 0 : index
      %17 = vector.load %arg5[%c0_14, %c0_15] : memref<128x128xbf16, #tpu.memory_space<vmem>>, vector<128x128xbf16>
      %cst_16 = arith.constant dense<0.000000e+00> : vector<16x128xf32>
      %18 = tpu.matmul %16, %17, %cst_16 {dimension_numbers = #tpu.dot_dimension_numbers<[1], [0], [0], [1], [0, 0, 1, 1], [], []>} : vector<16x128xbf16>, vector<128x128xbf16>, vector<16x128xf32> -> vector<16x128xf32>
      %c0_17 = arith.constant 0 : index
      %c0_18 = arith.constant 0 : index
      %19 = vector.load %arg6[%c0_17, %c0_18] : memref<1x128xf32, #tpu.memory_space<vmem>>, vector<1x128xf32>
      %20 = vector.broadcast %19 : vector<1x128xf32> to vector<16x128xf32>
      %21 = arith.addf %18, %20 : vector<16x128xf32>
      %c0_19 = arith.constant 0 : index
      %c0_20 = arith.constant 0 : index
      %22 = vector.load %arg7[%c0_19, %c0_20] : memref<16x128xf32, #tpu.memory_space<vmem>>, vector<16x128xf32>
      tpu.vector_store %arg7[%c0_19, %c0_20], %21 {strides = array<i32>} : memref<16x128xf32, #tpu.memory_space<vmem>>, vector<16x128xf32>,
    } else {
    }
    return
  }
  func.func @transform_0(%arg0: i32, %arg1: i32) -> (i32, i32) {
    %c0_i32 = arith.constant 0 : i32
    return %arg0, %arg1 : i32, i32
  }
  func.func @transform_1(%arg0: i32, %arg1: i32) -> (i32, i32) {
    %c0_i32 = arith.constant 0 : i32
    %c0_i32_0 = arith.constant 0 : i32
    return %arg1, %c0_i32 : i32, i32
  }
  func.func @transform_2(%arg0: i32, %arg1: i32) -> (i32, i32) {
    %c0_i32 = arith.constant 0 : i32
    %c0_i32_0 = arith.constant 0 : i32
    %c0_i32_1 = arith.constant 0 : i32
    return %c0_i32, %c0_i32_0 : i32, i32
  }
  func.func @transform_3(%arg0: i32, %arg1: i32) -> (i32, i32) {
    %c0_i32 = arith.constant 0 : i32
    %c0_i32_0 = arith.constant 0 : i32
    %c0_i32_1 = arith.constant 0 : i32
    return %c0_i32, %c0_i32_0 : i32, i32
  }
  func.func @transform_4(%arg0: i32, %arg1: i32) -> (i32, i32) {
    %c0_i32 = arith.constant 0 : i32
    %c0_i32_0 = arith.constant 0 : i32
    %c0_i32_1 = arith.constant 0 : i32
    return %c0_i32, %c0_i32_0 : i32, i32
  }
  func.func @transform_5(%arg0: i32, %arg1: i32) -> (i32, i32) {
    %c0_i32 = arith.constant 0 : i32
    %c0_i32_0 = arith.constant 0 : i32
    return %arg0, %c0_i32 : i32, i32
  }
}

</mosaic_0001>

<bundles_post_ra>
// kernel: linmodel_forward.1
= control target key start
LH: loop header
LB: loop body
LE: loop exit
PB: predicated region body
PF: predicated region fallthrough
CT: control target
= control target key end

     0   :  { %10 = vsyncpa [#allocation4], 0  ;;  %s1511_s0 = inlined_call_operand.hbm [shape: bf16[16,1024], index: 0, kind: input, shape index: {}]   ;;  %s1512_s1 = inlined_call_operand.hbm [shape: bf16[1024,128], index: 1, kind: input, shape index: {}]   ;;  %s1513_s2 = inlined_call_operand.hbm [shape: f32[1,128], index: 2, kind: input, shape index: {}]   ;;  %s1514_s3 = inlined_call_operand.hbm [shape: bf16[128,128], index: 3, kind: input, shape index: {}]   ;;  %s1515_s4 = inlined_call_operand.hbm [shape: f32[1,128], index: 4, kind: input, shape index: {}]   ;;  %s1516_s5 = inlined_call_operand.hbm [shape: f32[16,128], index: 5, kind: output, shape index: {}]  }
   0x1   :  { %11 = vsyncpa [#allocation7], 0 }
   0x2   :  { %12 = vsyncpa [#allocation10], 0 }
   0x3   :  { %13 = vsyncpa [#allocation5], 0  ;;  %s1395_s18 = smov [#allocation6]   ;;  %s1255_s22 = scalar_lea.hbm %s1512_s1, 8192 }
   0x4   :  { %s31_s19 = sshll.u32 %s1395_s18, 4  ;;  %p1256_p0 = scmp.ne.s32.totalorder %s1512_s1, %s1255_s22  ;;  %s32_s19 = int_to_ptr.vmem [resolvable:$true] %s31_s19 }
   0x5   :  { %p1259_p1 = scmp.lt.u32.totalorder %s1255_s22, %s1512_s1 }
   0x7   :  { %p1261_p2 = pnand %p1259_p1, %p1256_p0 }
   0x9   :  { %1264 = shalt.err (!%p1261_p2)
}
   0xa   :  { %s1265_s27 = scalar_lea.vmem %s32_s19, 8192  ;;  %p1270_p4 = scmp.lt.s32.totalorder %s32_s19, %s32_s19 }
   0xb   :  { %p1266_p3 = scmp.ne.s32.totalorder %s32_s19, %s1265_s27  ;;  %p1271_p5 = scmp.lt.s32.totalorder %s1265_s27, %s1265_s27 }
   0xd   :  { %p1272_p6 = por %p1271_p5, %p1270_p4 }
   0xf   :  { %p1273_p7 = pnand %p1272_p6, %p1266_p3 }
  0x11   :  { %1276 = shalt.err (!%p1273_p7)
}
  0x12   :  { %s1396_s28 = smov 64   ;;  %s1397_s29 = smov 4  }
  0x13   :  { %37 = dma.hbm_to_vmem [thread:$0]  %s1512_s1, 8192, %s32_s19, [#allocation7], %s1396_s28, %s1396_s28, %s1397_s29  }
  0x14   :  { %s1398_s7 = smov [#allocation9]   ;;  %s1399_s9 = smov [#allocation3]  }
  0x15   :  { %s53_s8 = sshll.u32 %s1398_s7, 4  ;;  %s19_s10 = sshll.u32 %s1399_s9, 4  ;;  %s54_s8 = int_to_ptr.vmem [resolvable:$true] %s53_s8  ;;  %s20_s10 = int_to_ptr.vmem [resolvable:$true] %s19_s10 }
  0x16   :  { %s1277_s13 = scalar_lea.hbm %s1514_s3, 1024 }
  0x17   :  { %p1278_p8 = scmp.ne.s32.totalorder %s1514_s3, %s1277_s13  ;;  %p1281_p9 = scmp.lt.u32.totalorder %s1277_s13, %s1514_s3 }
  0x19   :  { %p1283_p10 = pnand %p1281_p9, %p1278_p8 }
  0x1b   :  { %1286 = shalt.err (!%p1283_p10)
}
  0x1c   :  { %s1287_s1 = scalar_lea.vmem %s54_s8, 1024  ;;  %p1292_p12 = scmp.lt.s32.totalorder %s54_s8, %s54_s8 }
  0x1d   :  { %p1288_p11 = scmp.ne.s32.totalorder %s54_s8, %s1287_s1  ;;  %p1293_p13 = scmp.lt.s32.totalorder %s1287_s1, %s1287_s1 }
  0x1f   :  { %p1294_p0 = por %p1293_p13, %p1292_p12 }
  0x21   :  { %p1295_p1 = pnand %p1294_p0, %p1288_p11 }
  0x23   :  { %1298 = shalt.err (!%p1295_p1)
}
  0x24   :  { %59 = dma.hbm_to_vmem [thread:$0]  %s1514_s3, 1024, %s54_s8, [#allocation10], %s1396_s28, %s1396_s28, %s1397_s29  }
  0x25   :  { %s1299_s22 = scalar_lea.hbm %s1511_s0, 1024 }
  0x26   :  { %p1300_p2 = scmp.ne.s32.totalorder %s1511_s0, %s1299_s22  ;;  %p1303_p3 = scmp.lt.u32.totalorder %s1299_s22, %s1511_s0 }
  0x28   :  { %p1305_p4 = pnand %p1303_p3, %p1300_p2 }
  0x2a   :  { %1308 = shalt.err (!%p1305_p4)
}
  0x2b   :  { %s1309_s27 = scalar_lea.vmem %s20_s10, 1024  ;;  %p1314_p6 = scmp.lt.s32.totalorder %s20_s10, %s20_s10 }
  0x2c   :  { %p1310_p5 = scmp.ne.s32.totalorder %s20_s10, %s1309_s27  ;;  %p1315_p7 = scmp.lt.s32.totalorder %s1309_s27, %s1309_s27 }
  0x2e   :  { %p1316_p8 = por %p1315_p7, %p1314_p6 }
  0x30   :  { %p1317_p9 = pnand %p1316_p8, %p1310_p5 }
  0x32   :  { %1320 = shalt.err (!%p1317_p9)
}
  0x33   :  { %s1400_s3 = smov 512   ;;  %s1401_s28 = smov 32  }
  0x34   :  { %25 = dma.hbm_to_vmem [thread:$0]  %s1511_s0, 1024, %s20_s10, [#allocation4], %s1400_s3, %s1400_s3, %s1401_s28  }
  0x35   :  { %s1402_s6 = smov [#allocation8]   ;;  %s1403_s8 = smov [#allocation11]  }
  0x36   :  { %s44_s7 = sshll.u32 %s1402_s6, 4  ;;  %s66_s9 = sshll.u32 %s1403_s8, 4  ;;  %s45_s7 = int_to_ptr.vmem [resolvable:$true] %s44_s7  ;;  %s67_s9 = int_to_ptr.vmem [resolvable:$true] %s66_s9 }
  0x37   :  { %s1321_s13 = scalar_lea.hbm %s1513_s2, 16 }
  0x38   :  { %p1322_p10 = scmp.ne.s32.totalorder %s1513_s2, %s1321_s13  ;;  %p1325_p11 = scmp.lt.u32.totalorder %s1321_s13, %s1513_s2 }
  0x3a   :  { %p1327_p12 = pnand %p1325_p11, %p1322_p10 }
  0x3c   :  { %1330 = shalt.err (!%p1327_p12)
}
  0x3d   :  { %s1331_s0 = scalar_lea.vmem %s45_s7, 16  ;;  %s1335_s10 = scalar_lea.vmem %s45_s7, 32 }
  0x3e   :  { %p1332_p13 = scmp.ne.s32.totalorder %s45_s7, %s1331_s0  ;;  %p1336_p0 = scmp.lt.s32.totalorder %s45_s7, %s45_s7 }
  0x3f   :  { %p1337_p1 = scmp.lt.s32.totalorder %s1335_s10, %s1331_s0 }
  0x41   :  { %p1338_p2 = por %p1337_p1, %p1336_p0 }
  0x43   :  { %p1339_p3 = pnand %p1338_p2, %p1332_p13 }
  0x45   :  { %1342 = shalt.err (!%p1339_p3)
}
  0x46   :  { %47 = dma.hbm_to_vmem [thread:$0]  %s1513_s2, 16, %s45_s7, [#allocation7]  }
  0x47   :  { %s1343_s21 = scalar_lea.hbm %s1515_s4, 16 }
  0x48   :  { %p1344_p4 = scmp.ne.s32.totalorder %s1515_s4, %s1343_s21  ;;  %p1347_p5 = scmp.lt.u32.totalorder %s1343_s21, %s1515_s4 }
  0x4a   :  { %p1349_p6 = pnand %p1347_p5, %p1344_p4 }
  0x4c   :  { %1352 = shalt.err (!%p1349_p6)
}
  0x4d   :  { %s1353_s26 = scalar_lea.vmem %s67_s9, 16  ;;  %s1357_s27 = scalar_lea.vmem %s67_s9, 32 }
  0x4e   :  { %p1354_p7 = scmp.ne.s32.totalorder %s67_s9, %s1353_s26  ;;  %p1358_p8 = scmp.lt.s32.totalorder %s67_s9, %s67_s9 }
  0x4f   :  { %p1359_p9 = scmp.lt.s32.totalorder %s1357_s27, %s1353_s26 }
  0x51   :  { %p1360_p10 = por %p1359_p9, %p1358_p8 }
  0x53   :  { %p1361_p11 = pnand %p1360_p10, %p1354_p7 }
  0x55   :  { %1364 = shalt.err (!%p1361_p11)
}
  0x56   :  { %69 = dma.hbm_to_vmem [thread:$0]  %s1515_s4, 16, %s67_s9, [#allocation10]  }
  0x57   :  { %1387 = dma.done.wait [#allocation4], 1024  }
  0x58   :  { %1388 = vsyncadd [#allocation4], 4294966272 }
  0x59   :  { %1389 = dma.done.wait [#allocation7], 8208  }
  0x5a   :  { %1390 = vsyncadd [#allocation7], 4294959088 }
  0x5b   :  { %1391 = dma.done.wait [#allocation10], 1040  }
  0x5c   :  { %1392 = vsyncadd [#allocation10], 4294966256  ;;  %v1183_v0 = vld [vmem:[#allocation6 + $0x40] sm:$0xff]   ;;  %v1187_v4 = vld [vmem:[#allocation6 + $0x48] sm:$0xff]   ;;  %vm1405_vm0 = vmmov 0   ;;  %s1406_s4 = smov [#allocation12]  }
  0x5d   :  { %v1184_v1 = vld [vmem:[#allocation6 + $0xc0] sm:$0xff]   ;;  %1052 = vmatprep.subr.bf16.mxu0 %v1183_v0  ;;  %v1188_v5 = vld [vmem:[#allocation6 + $0xc8] sm:$0xff]   ;;  %v1191_v8 = vld [vmem:[#allocation6 + $0x50] sm:$0xff]   ;;  %s956_s28 = sshll.u32 %s1406_s4, 4  ;;  %s957_s28 = int_to_ptr.vmem [resolvable:$true] %s956_s28 }
  0x5e   :  { %v1185_v2 = vld [vmem:[#allocation6] sm:$0xff]   ;;  %1074 = vmatprep.subr.bf16.mxu1 %v1184_v1  ;;  %v1189_v6 = vld [vmem:[#allocation6 + $0x8] sm:$0xff]   ;;  %v1192_v9 = vld [vmem:[#allocation6 + $0xd0] sm:$0xff]   ;;  %s1365_s29 = scalar_lea.vmem %s957_s28, 256  ;;  %p1370_p13 = scmp.lt.s32.totalorder %s957_s28, %s957_s28 }
  0x5f   :  { %v1186_v3 = vld [vmem:[#allocation6 + $0x80] sm:$0xff]   ;;  %1053 = vmatpush3.bf16.msra.mxu0 %v1185_v2  ;;  %v1190_v7 = vld [vmem:[#allocation6 + $0x88] sm:$0xff]   ;;  %v1193_v10 = vld [vmem:[#allocation6 + $0x10] sm:$0xff]   ;;  %p1366_p12 = scmp.ne.s32.totalorder %s957_s28, %s1365_s29  ;;  %p1371_p0 = scmp.lt.s32.totalorder %s1365_s29, %s1365_s29 }
  0x60   :  { %1075 = vmatpush3.bf16.msra.mxu1 %v1186_v3  ;;  %1054 = vmatprep.subr.bf16.mxu0 %v1187_v4  ;;  %v1194_v11 = vld [vmem:[#allocation6 + $0x90] sm:$0xff]   ;;  %v1195_v12 = vld [vmem:[#allocation6 + $0x58] sm:$0xff]   ;;  %v1199_v16 = vld [vmem:[#allocation6 + $0x60] sm:$0xff]  }
  0x61   :  { %1076 = vmatprep.subr.bf16.mxu1 %v1188_v5  ;;  %v1196_v13 = vld [vmem:[#allocation6 + $0xd8] sm:$0xff]   ;;  %v1200_v17 = vld [vmem:[#allocation6 + $0xe0] sm:$0xff]   ;;  %v1203_v20 = vld [vmem:[#allocation6 + $0x68] sm:$0xff]   ;;  %p1372_p1 = por %p1371_p0, %p1370_p13 }
  0x62   :  { %v1197_v14 = vld [vmem:[#allocation6 + $0x18] sm:$0xff]   ;;  %v1201_v18 = vld [vmem:[#allocation6 + $0x20] sm:$0xff]   ;;  %v1204_v21 = vld [vmem:[#allocation6 + $0xe8] sm:$0xff]  }
  0x63   :  { %1055 = vmatpush3.bf16.msra.mxu0 %v1189_v6  ;;  %v1198_v15 = vld [vmem:[#allocation6 + $0x98] sm:$0xff]   ;;  %v1202_v19 = vld [vmem:[#allocation6 + $0xa0] sm:$0xff]   ;;  %v1205_v22 = vld [vmem:[#allocation6 + $0x28] sm:$0xff]   ;;  %p1373_p2 = pnand %p1372_p1, %p1366_p12 }
  0x64   :  { %1077 = vmatpush3.bf16.msra.mxu1 %v1190_v7  ;;  %1056 = vmatprep.subr.bf16.mxu0 %v1191_v8  ;;  %v1206_v23 = vld [vmem:[#allocation6 + $0xa8] sm:$0xff]   ;;  %v1207_v24 = vld [vmem:[#allocation6 + $0x70] sm:$0xff]   ;;  %v1211_v28 = vld [vmem:[#allocation6 + $0x78] sm:$0xff]  }
  0x65   :  { %1078 = vmatprep.subr.bf16.mxu1 %v1192_v9  ;;  %v1208_v25 = vld [vmem:[#allocation6 + $0xf0] sm:$0xff]   ;;  %v1212_v29 = vld [vmem:[#allocation6 + $0xf8] sm:$0xff]   ;;  %v94_v32 = vld [vmem:[#allocation3] sm:$0xff] }
  0x66   :  { %v1209_v26 = vld [vmem:[#allocation6 + $0x30] sm:$0xff]   ;;  %v1213_v30 = vld [vmem:[#allocation6 + $0x38] sm:$0xff]   ;;  %v98_v33 = vld [vmem:[#allocation3 + $0x20] sm:$0xff] }
  0x67   :  { %1057 = vmatpush3.bf16.msra.mxu0 %v1193_v10  ;;  %v1210_v27 = vld [vmem:[#allocation6 + $0xb0] sm:$0xff]   ;;  %v1214_v31 = vld [vmem:[#allocation6 + $0xb8] sm:$0xff]   ;;  %v95_v34 = vld [vmem:[#allocation3 + $0x8] sm:$0xff]  ;;  %v970_v35 = vcombine.low %v94_v32, %v98_v33  ;;  %v971_v36 = vcombine.high %v94_v32, %v98_v33 }
  0x68   :  { %1079 = vmatpush3.bf16.msra.mxu1 %v1194_v11  ;;  %1058 = vmatprep.subr.bf16.mxu0 %v1195_v12  ;;  %v99_v37 = vld [vmem:[#allocation3 + $0x28] sm:$0xff]  ;;  %v1215_v40 = vld [vmem:[#allocation6 + $0x140] sm:$0xff]   ;;  %v1223_v48 = vld [vmem:[#allocation6 + $0x150] sm:$0xff]  }
  0x69   :  { %1080 = vmatprep.subr.bf16.mxu1 %v1196_v13  ;;  %v972_v38 = vcombine.low %v95_v34, %v99_v37  ;;  %v973_v39 = vcombine.high %v95_v34, %v99_v37  ;;  %686 = vmatprep.mubr.bf16.mxu0 %v971_v36  ;;  %v1216_v41 = vld [vmem:[#allocation6 + $0x1c0] sm:$0xff]   ;;  %v1219_v44 = vld [vmem:[#allocation6 + $0x148] sm:$0xff]   ;;  %v1224_v49 = vld [vmem:[#allocation6 + $0x1d0] sm:$0xff]  }
  0x6a   :  { %v1217_v42 = vld [vmem:[#allocation6 + $0x100] sm:$0xff]   ;;  %v1220_v45 = vld [vmem:[#allocation6 + $0x1c8] sm:$0xff]   ;;  %v1225_v50 = vld [vmem:[#allocation6 + $0x110] sm:$0xff]  }
  0x6b   :  { %1059 = vmatpush3.bf16.msra.mxu0 %v1197_v14  ;;  %727 = vmatprep.mubr.bf16.mxu1 %v973_v39  ;;  %v1218_v43 = vld [vmem:[#allocation6 + $0x180] sm:$0xff]   ;;  %v1221_v46 = vld [vmem:[#allocation6 + $0x108] sm:$0xff]   ;;  %v1226_v51 = vld [vmem:[#allocation6 + $0x190] sm:$0xff]  }
  0x6c   :  { %1081 = vmatpush3.bf16.msra.mxu1 %v1198_v15  ;;  %1060 = vmatprep.subr.bf16.mxu0 %v1199_v16  ;;  %v1222_v47 = vld [vmem:[#allocation6 + $0x188] sm:$0xff]   ;;  %v1227_v52 = vld [vmem:[#allocation6 + $0x158] sm:$0xff]   ;;  %v1231_v56 = vld [vmem:[#allocation6 + $0x160] sm:$0xff]  }
  0x6d   :  { %1082 = vmatprep.subr.bf16.mxu1 %v1200_v17  ;;  %v1228_v53 = vld [vmem:[#allocation6 + $0x1d8] sm:$0xff]   ;;  %v1232_v57 = vld [vmem:[#allocation6 + $0x1e0] sm:$0xff]   ;;  %v1235_v60 = vld [vmem:[#allocation6 + $0x168] sm:$0xff]   ;;  %v1404_v17 = vmov 0.0  }
  0x6e   :  { %v1229_v54 = vld [vmem:[#allocation6 + $0x118] sm:$0xff]   ;;  %v1233_v58 = vld [vmem:[#allocation6 + $0x120] sm:$0xff]   ;;  %v1236_v61 = vld [vmem:[#allocation6 + $0x1e8] sm:$0xff]  }
  0x6f   :  { %1061 = vmatpush3.bf16.msra.mxu0 %v1201_v18  ;;  %v1230_v55 = vld [vmem:[#allocation6 + $0x198] sm:$0xff]   ;;  %v1234_v59 = vld [vmem:[#allocation6 + $0x1a0] sm:$0xff]   ;;  %v1237_v62 = vld [vmem:[#allocation6 + $0x128] sm:$0xff]  }
  0x70   :  { %1083 = vmatpush3.bf16.msra.mxu1 %v1202_v19  ;;  %1062 = vmatprep.subr.bf16.mxu0 %v1203_v20  ;;  %v1238_v63 = vld [vmem:[#allocation6 + $0x1a8] sm:$0xff]   ;;  %v1239_v0 = vld [vmem:[#allocation6 + $0x170] sm:$0xff]   ;;  %v1243_v4 = vld [vmem:[#allocation6 + $0x178] sm:$0xff]  }
  0x71   :  { %1084 = vmatprep.subr.bf16.mxu1 %v1204_v21  ;;  %v1240_v1 = vld [vmem:[#allocation6 + $0x1f0] sm:$0xff]   ;;  %v1244_v5 = vld [vmem:[#allocation6 + $0x1f8] sm:$0xff]   ;;  %v1247_v16 = vld [vmem:[#allocation9] sm:$0xff]  }
  0x72   :  { %v1241_v2 = vld [vmem:[#allocation6 + $0x130] sm:$0xff]   ;;  %v1245_v6 = vld [vmem:[#allocation6 + $0x138] sm:$0xff]   ;;  %v1251_v21 = vld [vmem:[#allocation9 + $0x20] sm:$0xff]  }
  0x73   :  { %1063 = vmatpush3.bf16.msra.mxu0 %v1205_v22  ;;  %v1242_v3 = vld [vmem:[#allocation6 + $0x1b0] sm:$0xff]   ;;  %v1246_v7 = vld [vmem:[#allocation6 + $0x1b8] sm:$0xff]  }
  0x74   :  { %1085 = vmatpush3.bf16.msra.mxu1 %v1206_v23  ;;  %1064 = vmatprep.subr.bf16.mxu0 %v1207_v24  ;;  %v96_v8 = vld [vmem:[#allocation3 + $0x10] sm:$0xff]  ;;  %v97_v12 = vld [vmem:[#allocation3 + $0x18] sm:$0xff] }
  0x75   :  { %1086 = vmatprep.subr.bf16.mxu1 %v1208_v25  ;;  %v100_v9 = vld [vmem:[#allocation3 + $0x30] sm:$0xff]  ;;  %v101_v13 = vld [vmem:[#allocation3 + $0x38] sm:$0xff] }
  0x76   :  { %v974_v10 = vcombine.low %v96_v8, %v100_v9  ;;  %v975_v11 = vcombine.high %v96_v8, %v100_v9  ;;  %v976_v14 = vcombine.low %v97_v12, %v101_v13  ;;  %v977_v15 = vcombine.high %v97_v12, %v101_v13  ;;  %v1248_v18 = vld [vmem:[#allocation9 + $0x8] sm:$0xff]   ;;  %v1249_v19 = vld [vmem:[#allocation9 + $0x10] sm:$0xff]   ;;  %v1250_v20 = vld [vmem:[#allocation9 + $0x18] sm:$0xff]  }
  0x77   :  { %1065 = vmatpush3.bf16.msra.mxu0 %v1209_v26  ;;  %v1252_v22 = vld [vmem:[#allocation9 + $0x28] sm:$0xff]   ;;  %v1253_v23 = vld [vmem:[#allocation9 + $0x30] sm:$0xff]   ;;  %v1254_v24 = vld [vmem:[#allocation9 + $0x38] sm:$0xff]  }
  0x78   :  { %1087 = vmatpush3.bf16.msra.mxu1 %v1210_v27  ;;  %1066 = vmatprep.subr.bf16.mxu0 %v1211_v28 }
  0x79   :  { %1088 = vmatprep.subr.bf16.mxu1 %v1212_v29 }
  0x7b   :  { %1067 = vmatpush3.bf16.msra.mxu0 %v1213_v30 }
  0x7c   :  { %1089 = vmatpush3.bf16.msra.mxu1 %v1214_v31  ;;  %1096 = vmatprep.subr.bf16.mxu0 %v1215_v40 }
  0x7d   :  { %1118 = vmatprep.subr.bf16.mxu1 %v1216_v41 }
  0x7e   :  { %687 = vmatmul.mubr.bf16.vlgmr.msra.gmra.mrb[0].mxu0 %v970_v35 }
  0x7f   :  { %728 = vmatmul.mubr.bf16.vlgmr.msra.gmra.mrb[0].mxu1 %v972_v38  ;;  %1097 = vmatpush3.bf16.msra.mxu0 %v1217_v42 }
  0x80   :  { %1119 = vmatpush3.bf16.msra.mxu1 %v1218_v43  ;;  %1098 = vmatprep.subr.bf16.mxu0 %v1219_v44 }
  0x81   :  { %1120 = vmatprep.subr.bf16.mxu1 %v1220_v45  ;;  %768 = vmatprep.mubr.bf16.mxu0 %v975_v11 }
  0x82   :  { %809 = vmatprep.mubr.bf16.mxu1 %v977_v15 }
  0x83   :  { %1099 = vmatpush3.bf16.msra.mxu0 %v1221_v46 }
  0x84   :  { %1121 = vmatpush3.bf16.msra.mxu1 %v1222_v47  ;;  %1100 = vmatprep.subr.bf16.mxu0 %v1223_v48 }
  0x85   :  { %1122 = vmatprep.subr.bf16.mxu1 %v1224_v49 }
  0x87   :  { %1101 = vmatpush3.bf16.msra.mxu0 %v1225_v50 }
  0x88   :  { %1123 = vmatpush3.bf16.msra.mxu1 %v1226_v51  ;;  %1102 = vmatprep.subr.bf16.mxu0 %v1227_v52 }
  0x89   :  { %1124 = vmatprep.subr.bf16.mxu1 %v1228_v53 }
  0x8b   :  { %1103 = vmatpush3.bf16.msra.mxu0 %v1229_v54  ;;  %v1042_v54 = vld [vmem:[#allocation8] ss:$0 sm:$0xff] }
  0x8c   :  { %1125 = vmatpush3.bf16.msra.mxu1 %v1230_v55  ;;  %1104 = vmatprep.subr.bf16.mxu0 %v1231_v56 }
  0x8d   :  { %1126 = vmatprep.subr.bf16.mxu1 %v1232_v57 }
  0x8f   :  { %1105 = vmatpush3.bf16.msra.mxu0 %v1233_v58 }
  0x90   :  { %1127 = vmatpush3.bf16.msra.mxu1 %v1234_v59  ;;  %1106 = vmatprep.subr.bf16.mxu0 %v1235_v60  ;;  %v1043_v59 = vld [vmem:[#allocation11] ss:$0 sm:$0xff] }
  0x91   :  { %1128 = vmatprep.subr.bf16.mxu1 %v1236_v61 }
  0x93   :  { %1107 = vmatpush3.bf16.msra.mxu0 %v1237_v62 }
  0x94   :  { %1129 = vmatpush3.bf16.msra.mxu1 %v1238_v63  ;;  %1108 = vmatprep.subr.bf16.mxu0 %v1239_v0 }
  0x95   :  { %1130 = vmatprep.subr.bf16.mxu1 %v1240_v1 }
  0x97   :  { %1109 = vmatpush3.bf16.msra.mxu0 %v1241_v2 }
  0x98   :  { %1131 = vmatpush3.bf16.msra.mxu1 %v1242_v3  ;;  %1110 = vmatprep.subr.bf16.mxu0 %v1243_v4 }
  0x99   :  { %1132 = vmatprep.subr.bf16.mxu1 %v1244_v5 }
  0x9b   :  { %1111 = vmatpush3.bf16.msra.mxu0 %v1245_v6 }
  0x9c   :  { %1133 = vmatpush3.bf16.msra.mxu1 %v1246_v7  ;;  %1149 = vmatprep.subr.bf16.mxu0 %v1404_v17 }
  0x9e   :  { %769 = vmatmul.mubr.bf16.vlgmr.msra.gmra.mrb[4].mxu0 %v974_v10 }
  0x9f   :  { %810 = vmatmul.mubr.bf16.vlgmr.msra.gmra.mrb[4].mxu1 %v976_v14  ;;  %1150 = vmatpush3.bf16.msra.mxu0 %v1247_v16 }
  0xa0   :  { %1151 = vmatprep.subr.bf16.mxu0 %v1404_v17  ;;  %1165 = vmatprep.mubr.msk.bf16.mxu0 %vm1405_vm0, %v1404_v17 }
  0xa3   :  { %1152 = vmatpush3.bf16.msra.mxu0 %v1248_v18 }
  0xa4   :  { %1153 = vmatprep.subr.bf16.mxu0 %v1404_v17 }
  0xa7   :  { %1154 = vmatpush3.bf16.msra.mxu0 %v1249_v19 }
  0xa8   :  { %1155 = vmatprep.subr.bf16.mxu0 %v1404_v17 }
  0xab   :  { %1156 = vmatpush3.bf16.msra.mxu0 %v1250_v20 }
  0xac   :  { %1157 = vmatprep.subr.bf16.mxu0 %v1404_v17 }
  0xaf   :  { %1158 = vmatpush3.bf16.msra.mxu0 %v1251_v21 }
  0xb0   :  { %1159 = vmatprep.subr.bf16.mxu0 %v1404_v17 }
  0xb3   :  { %1160 = vmatpush3.bf16.msra.mxu0 %v1252_v22 }
  0xb4   :  { %1161 = vmatprep.subr.bf16.mxu0 %v1404_v17 }
  0xb7   :  { %1162 = vmatpush3.bf16.msra.mxu0 %v1253_v23 }
  0xb8   :  { %1163 = vmatprep.subr.bf16.mxu0 %v1404_v17 }
  0xbb   :  { %1164 = vmatpush3.bf16.msra.mxu0 %v1254_v24 }
 0x151   :  { %v1068_v25 = vpop.f32.mrb[0].mxu0 }
 0x152   :  { %v1090_v26 = vpop.f32.mrb[0].mxu1  ;;  %v1069_v27 = vpop.f32.mrb[1].mxu0 }
 0x153   :  { %v1070_v28 = vadd.f32 %v1069_v27, %v1068_v25  ;;  %v1091_v29 = vpop.f32.mrb[1].mxu1  ;;  %v1071_v30 = vpop.f32.mrb[2].mxu0 }
 0x154   :  { %v1092_v31 = vadd.f32 %v1091_v29, %v1090_v26  ;;  %v1093_v32 = vpop.f32.mrb[2].mxu1  ;;  %v1072_v33 = vpop.f32.mrb[3].mxu0 }
 0x155   :  { %v1073_v34 = vadd.f32 %v1072_v33, %v1071_v30  ;;  %v1094_v35 = vpop.f32.mrb[3].mxu1 }
 0x156   :  { %v730_v36 = vadd.f32 %v1092_v31, %v1070_v28  ;;  %v1095_v37 = vadd.f32 %v1094_v35, %v1093_v32 }
 0x158   :  { %v733_v38 = vadd.f32 %v1095_v37, %v1073_v34 }
 0x171   :  { %v1112_v39 = vpop.f32.mrb[4].mxu0 }
 0x172   :  { %v1134_v40 = vpop.f32.mrb[4].mxu1  ;;  %v1113_v41 = vpop.f32.mrb[5].mxu0 }
 0x173   :  { %v1114_v42 = vadd.f32 %v1113_v41, %v1112_v39  ;;  %v1135_v43 = vpop.f32.mrb[5].mxu1  ;;  %v1115_v44 = vpop.f32.mrb[6].mxu0 }
 0x174   :  { %v1136_v45 = vadd.f32 %v1135_v43, %v1134_v40  ;;  %v1137_v46 = vpop.f32.mrb[6].mxu1  ;;  %v1116_v47 = vpop.f32.mrb[7].mxu0 }
 0x175   :  { %v771_v48 = vadd.f32 %v1114_v42, %v730_v36  ;;  %v1117_v49 = vadd.f32 %v1116_v47, %v1115_v44  ;;  %v1138_v50 = vpop.f32.mrb[7].mxu1 }
 0x176   :  { %v1139_v51 = vadd.f32 %v1138_v50, %v1137_v46 }
 0x177   :  { %v812_v52 = vadd.f32 %v1136_v45, %v771_v48  ;;  %v774_v53 = vadd.f32 %v1117_v49, %v733_v38 }
 0x179   :  { %v815_v55 = vadd.f32 %v1139_v51, %v774_v53  ;;  %v834_v56 = vadd.f32 %v1042_v54, %v812_v52 }
 0x17b   :  { %v835_v57 = vadd.f32 %v1042_v54, %v815_v55 }
 0x17d   :  { %v836_v58 = vpack.c.bf16 %v835_v57, %v834_v56 }
 0x17f   :  { %1166 = vmatmul.mubr.bf16.vlgmr.msra.gmra.mrb[8].mxu0 %v836_v58 }
 0x252   :  { %v942_v60 = vpop.f32.mrb[8].mxu0 }
 0x253   :  { %v943_v61 = vadd.f32 %v1043_v59, %v942_v60  ;;  %v1167_v62 = vpop.f32.mrb[9].mxu0 }
 0x254   :  { %v945_v63 = vpop.f32.mrb[10].mxu0 }
 0x255   :  { %949 = vst [vmem:[#allocation12] sm:$0xff] %v943_v61  ;;  %v946_v0 = vadd.f32 %v1043_v59, %v945_v63  ;;  %v1168_v1 = vpop.f32.mrb[11].mxu0 }
 0x257   :  { %950 = vst [vmem:[#allocation12 + $0x8] sm:$0xff] %v946_v0 }
 0x258   :  { %1376 = shalt.err (!%p1373_p2)
}
 0x259   :  { %s1377_s7 = scalar_lea.hbm %s1516_s5, 256 }
 0x25a   :  { %p1378_p3 = scmp.ne.s32.totalorder %s1516_s5, %s1377_s7  ;;  %p1381_p4 = scmp.lt.u32.totalorder %s1377_s7, %s1516_s5 }
 0x25c   :  { %p1383_p5 = pnand %p1381_p4, %p1378_p3 }
 0x25e   :  { %1386 = shalt.err (!%p1383_p5)
}
 0x25f   :  { %s1407_s13 = smov 128   ;;  %s1408_s14 = smov 8  }
 0x260   :  { %962 = dma.vmem_to_hbm [thread:$0]  %s957_s28, 256, %s1516_s5, [#allocation5], %s1407_s13, %s1407_s13, %s1408_s14  }
 0x261   :  { %1393 = dma.done.wait [#allocation5], 256  }
 0x262   :  { %1394 = vsyncadd [#allocation5], 4294967040 }
 0x263   :  { %966 = vsyncpa [#allocation4], 1 }
 0x264   :  { %967 = vsyncpa [#allocation7], 1 }
 0x265   :  { %968 = vsyncpa [#allocation10], 1 }
 0x266   :  { %969 = vsyncpa [#allocation5], 1 }

</bundles_post_ra>
